<compile_context>
chip_gen: v7x
topology: tpu7x:2x2x1
jax: 0.10.0
libtpu: 0.0.40
codegen_flags: <defaults>
</compile_context>

<pallas_src>
import functools

import jax
import jax.numpy as jnp
from jax.experimental import pallas as pl
from jax.experimental.pallas import tpu as pltpu


def _round_up(x, m):
    return ((x + m - 1) // m) * m


def _vmem_capacity_bytes():
    """Best-effort per-core physical VMEM capacity of the local TPU."""
    try:
        cap = getattr(pltpu.get_tpu_info(), "vmem_capacity_bytes", None)
        if cap:
            return int(cap)
    except Exception:
        pass
    return 64 * 1024 * 1024          # conservative floor (v7x per-TensorCore)


def _conv_block_kernel(w_ref, xa_ref, xb_ref, shift_ref, *rest,
                       taps, c_in, has_film, activation):
    """One grid step == (batch element, output-length tile).

    w_ref     : (C_out, K*Cin)        conv weight, tap-major columns
    xa_ref    : (1, S*Cin, tile_m)    polyphase input tile (output positions)
    xb_ref    : (1, S*Cin, t_halo)    halo block starting right after xa
    shift_ref : (1, C_out, 1) f32     gamma*bias + beta (or bias if no FiLM)
    scale_ref : (1, C_out, 1) f32     gamma  (only present if has_film)
    o_ref     : (1, C_out, tile_m)    output tile (NCL, lane axis = L)
    """
    if has_film:
        scale_ref, o_ref = rest
    else:
        (o_ref,) = rest

    xa = xa_ref[0]                    # (S*Cin, tile_m)
    xb = xb_ref[0]                    # (S*Cin, t_halo)
    tile_m = xa.shape[-1]

    # Stack the K shifted/phased slices into one (K*Cin, tile_m) operand so the
    # conv is a single MXU contraction of depth K*Cin.
    pieces = []
    for (p, q) in taps:               # (phase, output-position offset), static
        r0, r1 = p * c_in, (p + 1) * c_in
        if q == 0:
            pieces.append(xa[r0:r1, :])
        elif q == tile_m:             # window starts exactly at the halo block
            pieces.append(xb[r0:r1, :q])
        else:
            pieces.append(jnp.concatenate([xa[r0:r1, q:], xb[r0:r1, :q]],
                                          axis=-1))
    x_stack = pieces[0] if len(pieces) == 1 else jnp.concatenate(pieces, axis=0)

    # One matmul per tile, f32 accumulation; L stays on the lane axis so the
    # store is lane-dense NCL.
    acc = jnp.dot(w_ref[...], x_stack, preferred_element_type=jnp.float32)

    # FiLM (conv bias already folded into shift on the host).
    if has_film:
        acc = acc * scale_ref[0] + shift_ref[0]
    else:
        acc = acc + shift_ref[0]

    if activation == "relu":
        acc = jnp.maximum(acc, 0.0)
    elif activation == "tanh":
        acc = jnp.tanh(acc)
    elif activation == "sigmoid":
        acc = jax.nn.sigmoid(acc)
    else:
        # TODO(synk): ronn's get_activation() supports more (PReLU, ELU, ...);
        # only relu/tanh/sigmoid are wired up here.
        raise ValueError(f"unsupported activation: {activation}")

    o_ref[0] = acc.astype(o_ref.dtype)


def conv_block_forward(x, y, params, *, stride, dilation, activation="relu",
                       out_dtype=jnp.float32, compute_dtype=jnp.bfloat16):
    """Pallas implementation of ConvolutionalBlock.forward.

    x: (B, Cin, L) float32 (NCL, like PyTorch);  y: (B, cond_dim) or None.
    Returns (B, C_out, L_out) in out_dtype.
    """
    wconv, bconv, wadpt, badpt = params
    b, c_in, length = x.shape
    c_out, _, k = wconv.shape
    s = int(stride)
    d = int(dilation)

    # PyTorch Conv1d output length (VALID padding).
    l_out = (length - d * (k - 1) - 1) // s + 1
    assert l_out > 0, "input too short for this kernel/stride/dilation"

    # Polyphase tap table: out[n] uses, for tap kk,
    #   x[ci, n*s + kk*d] == x_poly[phase*Cin + ci, n + offset]
    taps = tuple(((kk * d) % s, (kk * d) // s) for kk in range(k))
    halo_m = (d * (k - 1)) // s
    s_cin = s * c_in

    in_bytes = jnp.dtype(compute_dtype).itemsize
    out_bytes = jnp.dtype(out_dtype).itemsize

    # ---- tile sizing (VMEM-derived, halo-aware, megacore-aware) -----------
    t_halo = _round_up(max(halo_m, 1), 128)

    vmem_cap = _vmem_capacity_bytes()
    budget = min(vmem_cap // 2, 48 * 1024 * 1024)          # v7x-safe tiling budget
    fixed = (2 * s_cin * t_halo * in_bytes                  # halo blocks (x2 buf)
             + 2 * c_out * k * c_in * in_bytes              # weight
             + 8 * c_out * 4)                               # FiLM vectors
    per_col = 2 * (s_cin * in_bytes + c_out * out_bytes)    # x tile + out (x2 buf)
    cap_cols = max(128, ((budget - fixed) // max(per_col, 1)) // 128 * 128)

    tile_m = min(4096, cap_cols, _round_up(l_out, 128))
    if _round_up(l_out, 128) > 4 * t_halo:
        tile_m = max(tile_m, 4 * t_halo)      # bound halo re-read overhead (<~25%)
    tile_m = min(tile_m, max(cap_cols, t_halo))
    tile_m = _round_up(max(tile_m, 128), t_halo)            # t_halo | tile_m
    if b == 1:                                 # keep >=2 grid points for 2-TC chips
        while tile_m > max(t_halo, 128) and pl.cdiv(l_out, tile_m) < 2:
            tile_m -= t_halo

    n_lt = pl.cdiv(l_out, tile_m)
    l_pad = n_lt * tile_m
    m_total = l_pad + t_halo
    ratio = tile_m // t_halo

    # ---- host-side prep ----------------------------------------------------
    # Single cast + pad in compute dtype (no redundant f32 padding pass).
    x_c = x.astype(compute_dtype)
    need = m_total * s
    if need >= length:
        x_c = jnp.pad(x_c, ((0, 0), (0, 0), (0, need - length)))
    else:
        x_c = x_c[:, :, :need]     # dropped tail is never needed by any output
    # Fold stride phases into channels: x_poly[b, p*Cin+ci, m] = x[b, ci, m*s+p]
    # (identity reshape for stride == 1).
    x_poly = x_c.reshape(b, c_in, m_total, s)
    x_poly = jnp.transpose(x_poly, (0, 3, 1, 2)).reshape(b, s_cin, m_total)

    # Weight laid out tap-major along the contraction: (C_out, K*Cin).
    # TODO(synk): optionally zero-pad K*Cin toward the 128-lane granule on the
    # host (needs matching zero rows in the in-kernel stack); Mosaic pads vregs.
    w_stack = jnp.transpose(wconv, (0, 2, 1)).reshape(c_out, k * c_in)
    w_stack = w_stack.astype(compute_dtype)

    has_film = y is not None
    if has_film:
        # FiLM adapter hoisted: one (B, cond) @ (cond, 2*C_out) matmul for the
        # whole batch; conv bias folded into the additive term.
        film = (y.astype(jnp.float32) @ wadpt.T.astype(jnp.float32)
                + badpt.astype(jnp.float32))                # (B, 2*C_out)
        gamma, beta = film[:, :c_out], film[:, c_out:]
        scale = gamma.reshape(b, c_out, 1)
        shift = (gamma * bconv[None, :].astype(jnp.float32)
                 + beta).reshape(b, c_out, 1)
    else:
        scale = None
        shift = jnp.broadcast_to(
            bconv.astype(jnp.float32).reshape(1, c_out, 1), (b, c_out, 1))

    # ---- specs -------------------------------------------------------------
    in_specs = [
        pl.BlockSpec((c_out, k * c_in), lambda bi, ti: (0, 0)),              # W
        pl.BlockSpec((1, s_cin, tile_m), lambda bi, ti: (bi, 0, ti)),        # x tile
        pl.BlockSpec((1, s_cin, t_halo),
                     lambda bi, ti: (bi, 0, (ti + 1) * ratio)),              # halo
        pl.BlockSpec((1, c_out, 1), lambda bi, ti: (bi, 0, 0)),              # shift
    ]
    inputs = [w_stack, x_poly, x_poly, shift]
    if has_film:
        in_specs.append(pl.BlockSpec((1, c_out, 1), lambda bi, ti: (bi, 0, 0)))
        inputs.append(scale)

    kernel = functools.partial(
        _conv_block_kernel, taps=taps, c_in=c_in,
        has_film=has_film, activation=activation)

    flops = 2 * b * l_pad * c_out * k * c_in
    transcendentals = 0 if activation == "relu" else b * l_pad * c_out
    bytes_accessed = int(
        b * s_cin * (l_pad + n_lt * t_halo) * in_bytes      # streamed x + halo re-reads
        + c_out * k * c_in * in_bytes                        # weight
        + b * c_out * l_pad * out_bytes                      # output
        + b * c_out * 4 * (2 if has_film else 1))            # FiLM vectors

    vmem_limit = max(32 * 1024 * 1024,
                     min(vmem_cap * 3 // 4, 96 * 1024 * 1024))

    out = pl.pallas_call(
        kernel,
        out_shape=jax.ShapeDtypeStruct((b, c_out, l_pad), out_dtype),
        grid_spec=pltpu.PrefetchScalarGridSpec(
            num_scalar_prefetch=0,
            grid=(b, n_lt),
            in_specs=in_specs,
            out_specs=pl.BlockSpec((1, c_out, tile_m),
                                   lambda bi, ti: (bi, 0, ti)),
        ),
        compiler_params=pltpu.CompilerParams(
            dimension_semantics=("parallel", "parallel"),
            vmem_limit_bytes=vmem_limit),
        cost_estimate=pl.CostEstimate(
            flops=flops, transcendentals=transcendentals,
            bytes_accessed=bytes_accessed),
    )(*inputs)

    # Already NCL and already strided (polyphase); just drop the tile padding.
    return out[:, :, :l_out]


def _reference_forward(x, y, params, *, stride, dilation, activation="relu"):
    """Plain-JAX reference matching torch semantics, for validation."""
    wconv, bconv, wadpt, badpt = params
    c_out = wconv.shape[0]
    out = jax.lax.conv_general_dilated(
        x, wconv, window_strides=(stride,), padding="VALID",
        rhs_dilation=(dilation,), dimension_numbers=("NCH", "OIH", "NCH"))
    out = out + bconv[None, :, None]
    if y is not None:
        film = y @ wadpt.T + badpt                  # (B, 2*C_out)
        gamma, beta = film[:, :c_out], film[:, c_out:]
        out = out * gamma[:, :, None] + beta[:, :, None]
    if activation == "relu":
        return jnp.maximum(out, 0.0)
    if activation == "tanh":
        return jnp.tanh(out)
    if activation == "sigmoid":
        return jax.nn.sigmoid(out)
    raise ValueError(activation)


if __name__ == "__main__":
    # Small, deterministic problem consistent with the module's constructor.
    B, C_IN, C_OUT, K = 2, 4, 8, 3
    COND_DIM, L = 16, 64

    key = jax.random.PRNGKey(0)
    kx, ky, kw, kb, kaw, kab = jax.random.split(key, 6)

    x = jax.random.normal(kx, (B, C_IN, L), jnp.float32)
    y = jax.random.normal(ky, (B, COND_DIM), jnp.float32)

    # Deterministic synthetic parameters (shapes follow nn.Conv1d / nn.Linear).
    wconv = 0.1 * jax.random.normal(kw, (C_OUT, C_IN, K), jnp.float32)
    bconv = 0.1 * jax.random.normal(kb, (C_OUT,), jnp.float32)
    wadpt = 0.1 * jax.random.normal(kaw, (2 * C_OUT, COND_DIM), jnp.float32)
    badpt = 0.1 * jax.random.normal(kab, (2 * C_OUT,), jnp.float32)
    params = (wconv, bconv, wadpt, badpt)

    cases = [
        # (stride, dilation, use FiLM, activation, out_dtype, compute_dtype)
        dict(stride=1, dilation=2, film=True, activation="relu",
             out_dtype=jnp.float32, compute_dtype=jnp.bfloat16),
        dict(stride=1, dilation=2, film=False, activation="relu",
             out_dtype=jnp.bfloat16, compute_dtype=jnp.bfloat16),   # bf16 store path
        dict(stride=2, dilation=3, film=True, activation="tanh",
             out_dtype=jnp.float32, compute_dtype=jnp.float32),     # polyphase + f32
    ]
    for cfg in cases:
        yy = y if cfg["film"] else None
        out = conv_block_forward(
            x, yy, params, stride=cfg["stride"], dilation=cfg["dilation"],
            activation=cfg["activation"], out_dtype=cfg["out_dtype"],
            compute_dtype=cfg["compute_dtype"])
        out = jax.block_until_ready(out)
        ref = _reference_forward(
            x, yy, params, stride=cfg["stride"], dilation=cfg["dilation"],
            activation=cfg["activation"])
        assert out.shape == ref.shape, (cfg, out.shape, ref.shape)
        out_f32 = out.astype(jnp.float32)
        err = float(jnp.max(jnp.abs(out_f32 - ref)))
        # bf16-streamed operands with f32 accumulation: loose tolerance.
        assert jnp.allclose(out_f32, ref, atol=3e-2, rtol=3e-2), (cfg, err)

    print("KERNEL_OK")
</pallas_src>

<mosaic_0001>
module attributes {stable_mosaic.version = 11 : i64} {
  func.func @_conv_block_kernel(%arg0: i32, %arg1: i32, %arg2: memref<8x12xbf16, #tpu.memory_space<vmem>>, %arg3: memref<1x4x128xbf16, #tpu.memory_space<vmem>>, %arg4: memref<1x4x128xbf16, #tpu.memory_space<vmem>>, %arg5: memref<1x8x1xf32, #tpu.memory_space<vmem>>, %arg6: memref<1x8x1xf32, #tpu.memory_space<vmem>>, %arg7: memref<1x8x128xf32, #tpu.memory_space<vmem>>) attributes {dimension_semantics = [#tpu.dimension_semantics<parallel>, #tpu.dimension_semantics<parallel>], iteration_bounds = array<i64: 2, 1>, scalar_prefetch = 0 : i64, scratch_operands = 0 : i64, tpu.core_type = #tpu.core_type<tc>, window_params = [{pipeline_mode = #tpu.pipeline_mode<synchronous>, transform_indices = @transform_0, window_bounds = array<i64: 8, 12>}, {transform_indices = @transform_1, window_bounds = array<i64: 1, 4, 128>}, {transform_indices = @transform_2, window_bounds = array<i64: 1, 4, 128>}, {transform_indices = @transform_3, window_bounds = array<i64: 1, 8, 1>}, {transform_indices = @transform_4, window_bounds = array<i64: 1, 8, 1>}, {transform_indices = @transform_5, window_bounds = array<i64: 1, 8, 128>}]} {
    %c0 = arith.constant 0 : index
    %c0_0 = arith.constant 0 : index
    %c0_1 = arith.constant 0 : index
    %0 = vector.load %arg3[%c0, %c0_0, %c0_1] : memref<1x4x128xbf16, #tpu.memory_space<vmem>>, vector<1x4x128xbf16>
    %1 = vector.shape_cast %0 : vector<1x4x128xbf16> to vector<4x128xbf16>
    %c0_2 = arith.constant 0 : index
    %c0_3 = arith.constant 0 : index
    %c0_4 = arith.constant 0 : index
    %2 = vector.load %arg4[%c0_2, %c0_3, %c0_4] : memref<1x4x128xbf16, #tpu.memory_space<vmem>>, vector<1x4x128xbf16>
    %3 = vector.shape_cast %2 : vector<1x4x128xbf16> to vector<4x128xbf16>
    %4 = vector.extract_strided_slice %1 {offsets = [0, 2], sizes = [4, 126], strides = [1, 1]} : vector<4x128xbf16> to vector<4x126xbf16>
    %5 = vector.extract_strided_slice %3 {offsets = [0, 0], sizes = [4, 2], strides = [1, 1]} : vector<4x128xbf16> to vector<4x2xbf16>
    %6 = tpu.concatenate %4, %5 in 1 : vector<4x126xbf16>, vector<4x2xbf16> -> vector<4x128xbf16>
    %7 = vector.extract_strided_slice %1 {offsets = [0, 4], sizes = [4, 124], strides = [1, 1]} : vector<4x128xbf16> to vector<4x124xbf16>
    %8 = vector.extract_strided_slice %3 {offsets = [0, 0], sizes = [4, 4], strides = [1, 1]} : vector<4x128xbf16> to vector<4x4xbf16>
    %9 = tpu.concatenate %7, %8 in 1 : vector<4x124xbf16>, vector<4x4xbf16> -> vector<4x128xbf16>
    %10 = tpu.concatenate %1, %6, %9 in 0 : vector<4x128xbf16>, vector<4x128xbf16>, vector<4x128xbf16> -> vector<12x128xbf16>
    %c0_5 = arith.constant 0 : index
    %c0_6 = arith.constant 0 : index
    %11 = vector.load %arg2[%c0_5, %c0_6] : memref<8x12xbf16, #tpu.memory_space<vmem>>, vector<8x12xbf16>
    %cst = arith.constant dense<0.000000e+00> : vector<8x128xf32>
    %12 = tpu.matmul %11, %10, %cst {dimension_numbers = #tpu.dot_dimension_numbers<[1], [0], [0], [1], [0, 0, 1, 1], [], []>} : vector<8x12xbf16>, vector<12x128xbf16>, vector<8x128xf32> -> vector<8x128xf32>
    %c0_7 = arith.constant 0 : index
    %c0_8 = arith.constant 0 : index
    %c0_9 = arith.constant 0 : index
    %13 = vector.load %arg6[%c0_7, %c0_8, %c0_9] : memref<1x8x1xf32, #tpu.memory_space<vmem>>, vector<1x8x1xf32>
    %14 = vector.shape_cast %13 : vector<1x8x1xf32> to vector<8x1xf32>
    %15 = vector.broadcast %14 : vector<8x1xf32> to vector<8x128xf32>
    %16 = arith.mulf %12, %15 : vector<8x128xf32>
    %c0_10 = arith.constant 0 : index
    %c0_11 = arith.constant 0 : index
    %c0_12 = arith.constant 0 : index
    %17 = vector.load %arg5[%c0_10, %c0_11, %c0_12] : memref<1x8x1xf32, #tpu.memory_space<vmem>>, vector<1x8x1xf32>
    %18 = vector.shape_cast %17 : vector<1x8x1xf32> to vector<8x1xf32>
    %19 = vector.broadcast %18 : vector<8x1xf32> to vector<8x128xf32>
    %20 = arith.addf %16, %19 : vector<8x128xf32>
    %cst_13 = arith.constant 0.000000e+00 : f32
    %21 = vector.broadcast %cst_13 : f32 to vector<8x128xf32>
    %22 = arith.maximumf %20, %21 : vector<8x128xf32>
    %c0_14 = arith.constant 0 : index
    %c0_15 = arith.constant 0 : index
    %c0_16 = arith.constant 0 : index
    %23 = vector.load %arg7[%c0_14, %c0_15, %c0_16] : memref<1x8x128xf32, #tpu.memory_space<vmem>>, vector<1x8x128xf32>
    %24 = vector.shape_cast %23 : vector<1x8x128xf32> to vector<8x128xf32>
    %25 = vector.shape_cast %22 : vector<8x128xf32> to vector<1x8x128xf32>
    tpu.vector_store %arg7[%c0_14, %c0_15, %c0_16], %25 {strides = array<i32>} : memref<1x8x128xf32, #tpu.memory_space<vmem>>, vector<1x8x128xf32>,
    return
  }
  func.func @transform_0(%arg0: i32, %arg1: i32) -> (i32, i32) {
    %c0_i32 = arith.constant 0 : i32
    %c0_i32_0 = arith.constant 0 : i32
    %c0_i32_1 = arith.constant 0 : i32
    return %c0_i32, %c0_i32_0 : i32, i32
  }
  func.func @transform_1(%arg0: i32, %arg1: i32) -> (i32, i32, i32) {
    %c0_i32 = arith.constant 0 : i32
    %c0_i32_0 = arith.constant 0 : i32
    return %arg0, %c0_i32, %arg1 : i32, i32, i32
  }
  func.func @transform_2(%arg0: i32, %arg1: i32) -> (i32, i32, i32) {
    %c1_i32 = arith.constant 1 : i32
    %0 = arith.addi %arg1, %c1_i32 : i32
    %c1_i32_0 = arith.constant 1 : i32
    %1 = arith.muli %0, %c1_i32_0 : i32
    %c0_i32 = arith.constant 0 : i32
    %c0_i32_1 = arith.constant 0 : i32
    return %arg0, %c0_i32, %1 : i32, i32, i32
  }
  func.func @transform_3(%arg0: i32, %arg1: i32) -> (i32, i32, i32) {
    %c0_i32 = arith.constant 0 : i32
    %c0_i32_0 = arith.constant 0 : i32
    %c0_i32_1 = arith.constant 0 : i32
    return %arg0, %c0_i32, %c0_i32_0 : i32, i32, i32
  }
  func.func @transform_4(%arg0: i32, %arg1: i32) -> (i32, i32, i32) {
    %c0_i32 = arith.constant 0 : i32
    %c0_i32_0 = arith.constant 0 : i32
    %c0_i32_1 = arith.constant 0 : i32
    return %arg0, %c0_i32, %c0_i32_0 : i32, i32, i32
  }
  func.func @transform_5(%arg0: i32, %arg1: i32) -> (i32, i32, i32) {
    %c0_i32 = arith.constant 0 : i32
    %c0_i32_0 = arith.constant 0 : i32
    return %arg0, %c0_i32, %arg1 : i32, i32, i32
  }
}

</mosaic_0001>

<bundles_post_ra>
// kernel: tpu_custom_call.1
= control target key start
LH: loop header
LB: loop body
LE: loop exit
PB: predicated region body
PF: predicated region fallthrough
CT: control target
= control target key end

     0   :  { %10 = vsyncpa [#allocation3], 0  ;;  %s895_s0 = inlined_call_operand.vmem [shape: bf16[8,12], index: 0, kind: input, shape index: {}]   ;;  %s896_s1 = inlined_call_operand.vmem [shape: bf16[2,4,256], index: 1, kind: input, shape index: {}]   ;;  %s897_s2 = inlined_call_operand.vmem [shape: bf16[2,4,256], index: 2, kind: input, shape index: {}]   ;;  %s898_s3 = inlined_call_operand.vmem [shape: f32[2,8,1], index: 3, kind: input, shape index: {}]   ;;  %s899_s4 = inlined_call_operand.vmem [shape: f32[2,8,1], index: 4, kind: input, shape index: {}]   ;;  %s900_s5 = inlined_call_operand.hbm [shape: f32[2,8,128], index: 5, kind: output, shape index: {}]  }
   0x1   :  { %12 = vsyncpa [#allocation3 + $0x1], 0  ;;  %s771_s18 = smov 0   ;;  %s773_s19 = smov 0  }
   0x2   :  { %s775_s20 = smov 0   ;;  %s777_s21 = smov 0  }
   0x3   :  { %s779_s22 = smov 0   ;;  %s781_s23 = smov 0  }
   0x4 LB: > { %s561_s24 = sadd.s32 4294967295, %s732_s23   ;;  %s562_s25 = sadd.s32 4294967294, %s732_s23   ;;  %s732_s23 = sphi %s781_s23, %s18_s23   ;;  %s728_s22 = sphi %s779_s22, %s907_s22   ;;  %s724_s21 = sphi %s777_s21, %s906_s21   ;;  %s720_s20 = sphi %s775_s20, %s905_s20   ;;  %s716_s19 = sphi %s773_s19, %s904_s19   ;;  %s712_s18 = sphi %s771_s18, %s903_s18  }
   0x5   : > { %s30_s26 = sadd.s32 1, %s728_s22  ;;  %s170_s27 = sadd.s32 1, %s720_s20 }
   0x6   : > { %p32_p0 = scmp.ge.s32.totalorder %s30_s26, 2  ;;  %p180_p1 = scmp.ne.s32.totalorder %s720_s20, %s716_s19 }
   0x7   : > { %p181_p2 = scmp.eq.s32.totalorder %s561_s24, 1  ;;  %p186_p3 = scmp.ne.s32.totalorder %s716_s19, %s712_s18 }
   0x8   : > { %s909_s26 = smov (%p32_p0, %s30_s26), 0  ;;  %p187_p5 = scmp.eq.s32.totalorder %s562_s25, 1 }
   0x9   : > { %p811_p4 = por %p181_p2, %p180_p1  ;;  %s165_s29 = ssub.s32 %s728_s22, %s909_s26 }
   0xa   : > { %p565_p6 = scmp.ge.s32.totalorder %s732_s23, 1  ;;  %p168_p7 = scmp.eq.s32.totalorder %s165_s29, 0 }
   0xb   : > { %p818_p8 = por %p187_p5, %p186_p3  ;;  %p246_p9 = scmp.lt.s32.totalorder %s732_s23, 3 }
   0xc   : > { %s824_s6 = scalar_select %p168_p7, %s720_s20, %s170_s27  }
   0xd   : > { %p247_p10 = pnand %p565_p6, %p246_p9 }
   0xe   : > { %p294_p11 = scmp.lt.s32.totalorder (!%p247_p10), %s724_s21, 1  ;;  %v327_v0 = vlaneseq (!%p247_p10)  ;;  %v734_v1 = vmov (!%p247_p10), 1983009808   ;;  %v735_v4 = vmov (!%p247_p10), 0.0   ;;  %vm736_vm0 = vmmov (!%p247_p10), 0   ;;  %s737_s16 = smov (!%p247_p10), 124  }
   0xf   : > { %250 = sbr.rel (%p247_p10) target bundleno = 389 (0x185), region = 40  ;;  %v325_v2 = vunpack.c.l.s4 (!%p247_p10), %v734_v1  ;;  %585 = vmatprep.subr.bf16.mxu0 (!%p247_p10), %v735_v4  ;;  %587 = vmatprep.mubr.msk.bf16.mxu0 (!%p247_p10), %vm736_vm0, %v735_v4  ;;  %s738_s17 = smov (!%p247_p10), 126   ;;  %v739_v10 = vmov (!%p247_p10), 0   ;;  %vm351_vm1 = vcmask (!%p247_p10), 1014784   ;;  %vm343_vm2 = vcmask (!%p247_p10), 1031168  }
  0x10   : > { %v328_v3 = vshrl.u32 (!%p247_p10), %v327_v0, 7  ;;  %652 = vset.pattern.permute.xlu0 (!%p247_p10), %v739_v10  ;;  %653 = vset.pattern.permute.xlu1 (!%p247_p10), %v739_v10  ;;  %vm359_vm3 = vcmask (!%p247_p10), 1041408   ;;  %vm363_vm4 = vcmask (!%p247_p10), 1043456   ;;  %vm371_vm5 = vcmask (!%p247_p10), 1045504   ;;  %v366_v24 = vld [vmem:[%s895_s0] sm:$0xf] (!%p247_p10) }
  0x11   : > { %v326_v5 = vunpack.c.0.s8 (!%p247_p10), %v325_v2  ;;  %vm367_vm6 = vcmask (!%p247_p10), 97280   ;;  %s576_s14 = sshll.u32 (!%p247_p10), %s724_s21, 7 }
  0x12   : > { %s848_s25 = scalar_lea.hbm (!%p247_p10), %s900_s5, %s576_s14 }
  0x13   : > { %v329_v6 = vsub.s32 (!%p247_p10), %v326_v5, %v328_v3 }
  0x16   : > { %s295_s7 = scalar_select %p294_p11, %s724_s21, 1 }
  0x17   : > { %s740_s21 = smov [#allocation2]  }
  0x18   : > { %s579_s8 = sshll.u32 %s295_s7, 2  ;;  %s571_s24 = sshll.u32 %s295_s7, 3 }
  0x19   : > { %s301_s11 = scalar_lea.vmem %s896_s1, %s579_s8  ;;  %s581_s12 = sadd.s32 2, %s579_s8 }
  0x1a   : > { %v321_v7 = vld [vmem:[%s301_s11] sm:$0x3]  ;;  %s310_s15 = scalar_lea.vmem %s897_s2, %s581_s12  ;;  %s319_s29 = scalar_lea.vmem %s899_s4, %s571_s24 }
  0x1b   : > { %v330_v8 = vrot.slane %v321_v7, %v329_v6  ;;  %v573_v9 = vld.sshfl [vmem:[%s310_s15] sm:$0x3 pattern:$0x76325410]  ;;  %s315_s10 = scalar_lea.vmem %s898_s3, %s571_s24  ;;  %s291_s12 = sand.u32 1, %s716_s19  }
  0x1c   : > { %v414_v11 = vld [vmem:[%s319_s29] sm:$0xff]  ;;  %s566_s13 = sshll.u32 %s291_s12, 3  ;;  %s431_s27 = scalar_lea.sflag [#allocation3], %s291_s12 }
  0x1d   : > { %347 = vrot.lane.b32.xlu1 %v330_v8, %s737_s16  ;;  %331 = vrot.lane.b32.xlu0 %v330_v8, %s738_s17  ;;  %v421_v12 = vld [vmem:[%s315_s10] sm:$0xff]  ;;  %s293_s15 = scalar_lea.vmem [#allocation2], %s566_s13  ;;  %s658_s8 = sshll.u32 %s740_s21, 4  ;;  %s659_s8 = int_to_ptr.vmem [resolvable:$false] %s658_s8 }
  0x1e   : > { %s660_s9 = scalar_lea.vmem %s659_s8, 256 }
  0x21   : > { %349 = vrot.lane.b32.xlu1 %v573_v9, %s737_s16  ;;  %341 = vrot.lane.b32.xlu0 %v573_v9, %s738_s17  ;;  %s445_s16 = sshll.u32 %s293_s15, 4  ;;  %s850_s16 = int_to_ptr.vmem [resolvable:$true] %s445_s16 }
  0x22   : > { %s654_s29 = scalar_lea.vmem %s850_s16, 128  ;;  %p661_p1 = scmp.lt.s32.totalorder %s850_s16, %s659_s8 }
  0x23   : > { %p655_p12 = scmp.ne.s32.totalorder %s850_s16, %s654_s29  ;;  %p662_p2 = scmp.lt.s32.totalorder %s660_s9, %s654_s29 }
  0x25   : > { %417 = vperm.xlu0 %652, %v414_v11   ;;  %424 = vperm.xlu1 %653, %v421_v12   ;;  %p656_p13 = pnand %p655_p12, %p811_p4  ;;  %p663_p3 = por %p662_p2, %p661_p1 }
  0x27   : > { %p657_p0 = pneg %p656_p13 }
  0x29   : > { %p664_p5 = pnand %p663_p3, %p657_p0 }
  0x8f   : > { %v348_v13 = vpop.permute.xlu1 %347  ;;  %v332_v14 = vpop.permute.xlu0 %331 }
  0x93   : > { %v350_v15 = vpop.permute.xlu1 %349  ;;  %v342_v16 = vpop.permute.xlu0 %341 }
  0x94   : > { %v354_v17 = vsel %vm351_vm1, %v348_v13, %v350_v15  ;;  %v346_v18 = vsel %vm343_vm2, %v332_v14, %v342_v16 }
  0x95   : > { %v358_v19 = vrot.slane %v354_v17, 4  ;;  %v356_v20 = vrot.slane %v346_v18, 6 }
  0x97   : > { %v362_v21 = vsel %vm359_vm3, %v321_v7, %v356_v20 }
  0x98   : > { %v365_v22 = vsel %vm363_vm4, %v362_v21, %v358_v19 }
  0x99   : > { %v372_v23 = vsel %vm371_vm5, %v365_v22, 0 }
  0x9a   : > { %586 = vmatpush3.bf16.msra.mxu0 %v372_v23 }
  0x9d   : > { %588 = vmatmul.mubr.msk.bf16.vlgmr.msra.gmra.mrb[0].mxu0 %vm367_vm6, %v366_v24 }
  0xa4   : > { %v418_v25 = vpop.permute.xlu0 %417  ;;  %v425_v27 = vpop.permute.xlu1 %424 }
 0x170   : > { %v408_v26 = vpop.f32.mrb[0].mxu0 }
 0x171   : > { %v420_v28 = vmul.f32 %v418_v25, %v408_v26  ;;  %v589_v29 = vpop.f32.mrb[1].mxu0 }
 0x172   : > { %v411_v30 = vpop.f32.mrb[2].mxu0 }
 0x173   : > { %v427_v31 = vadd.f32 %v425_v27, %v420_v28  ;;  %v590_v32 = vpop.f32.mrb[3].mxu0 }
 0x175   : > { %v428_v33 = vmax.f32 %v427_v31, 0.0 }
 0x177   : > { %429 = vst [vmem:[%s293_s15] sm:$0xff] %v428_v33 }
 0x178   : > { %667 = shalt.err (!%p664_p5)
}
 0x179   : > { %s668_s10 = scalar_lea.hbm %s848_s25, 128  ;;  %s672_s12 = scalar_lea.hbm %s900_s5, 256 }
 0x17a   : > { %p669_p6 = scmp.ne.s32.totalorder %s848_s25, %s668_s10  ;;  %p673_p10 = scmp.lt.u32.totalorder %s848_s25, %s900_s5 }
 0x17b   : > { %p674_p11 = scmp.lt.u32.totalorder %s672_s12, %s668_s10  ;;  %p676_p13 = scmp.lt.u32.totalorder %s668_s10, %s848_s25 }
 0x17c   : > { %p670_p7 = pnand %p669_p6, %p811_p4 }
 0x17d   : > { %p675_p12 = por %p674_p11, %p673_p10 }
 0x17e   : > { %p671_p9 = pneg %p670_p7 }
 0x17f   : > { %p677_p0 = por %p676_p13, %p675_p12 }
 0x181   : > { %p678_p1 = pnand %p677_p0, %p671_p9 }
 0x183   : > { %681 = shalt.err (!%p678_p1)
}
 0x184   : > { %591 = dma.vmem_to_hbm [thread:$0]  (%p811_p4), %s850_s16, 128, %s848_s25, %s431_s27  }
 0x185 PF: > { %p597_p2 = scmp.ge.s32.totalorder %s732_s23, 2  ;;  %s457_s15 = sand.u32 1, %s712_s18  }
 0x186   : > { %s458_s17 = scalar_lea.sflag [#allocation3], %s457_s15 }
 0x187   : > { %p594_p3 = pnand %p597_p2, %p818_p8 }
 0x189   : > { %707 = dma.done.wait (!%p594_p3), %s458_s17, 128  }
 0x18a   : > { %709 = vsyncadd (!%p594_p3), %s458_s17, 4294967168  ;;  %s18_s23 = sadd.s32 1, %s732_s23   ;;  %s903_s18 = smov %s716_s19 }
 0x18b   : > { %p15_p5 = scmp.ge.s32.totalorder %s18_s23, 4   ;;  %s904_s19 = smov %s720_s20 }
 0x18c   : > { %s905_s20 = smov %s824_s6  ;;  %s906_s21 = smov %s728_s22 }
 0x18d   : > { %s907_s22 = smov %s909_s26  ;;  %17 = sbr.rel (!%p15_p5) target bundleno = 4 (0x4), region = 84 }
 0x194   :  { %463 = vsyncpa [#allocation3], 1 }
 0x195   :  { %465 = vsyncpa [#allocation3 + $0x1], 1 }

</bundles_post_ra>
